<compile_context>
chip_gen: v6e
topology: v6e:2x2x1
jax: 0.10.0
libtpu: 0.0.40
codegen_flags: <defaults>
</compile_context>

<pallas_src>
import numpy as np
import jax
import jax.numpy as jnp
from jax.experimental import pallas as pl
from jax.experimental.pallas import tpu as pltpu


# ----------------------------------------------------------------------------
# Config (mirrors the cfg fields Basenet.forward reads)
# ----------------------------------------------------------------------------
class Cfg:
    image_size = (16, 16)      # H, W
    out_size = (8, 8)          # OH, OW (feature map fed to roi_align)
    emb_features = 8           # D: channels of the multiscale feature map
    crop_size = (5, 5)         # K x K roi_align output
    num_features_boxes = 32    # NFB
    num_actions = 8
    num_boxes = 4              # MAX_N
    train_dropout_prob = 0.3   # dropout is identity at inference


LANE = 128
SUB = 8


def _round_up(x, m):
    return ((x + m - 1) // m) * m


def _choose_fpb(BT, MAX_N, target_rows=256):
    """Frames per kernel block: keep sublane dims 8-aligned and grow the block
    until the emb matmul has ~target_rows rows (MXU fill) or covers the batch."""
    Pper = MAX_N * (MAX_N - 1)
    base = 1
    while (base * MAX_N) % SUB or (base * Pper) % SUB:
        base += 1                      # base <= 8 always terminates
    fpb = base
    while fpb * MAX_N < target_rows and fpb + base <= _round_up(BT, base):
        fpb += base
    return fpb


# ----------------------------------------------------------------------------
# Pallas kernel: fused FC chain, one frame-block per grid step.
#   emb   = relu(crops @ W_emb + b_emb)                      (dropout = identity)
#   act   = emb @ W_act + b_act                              (dense over MAX_N)
#   pair  = [S_src; S_dst] @ emb                             (one stacked one-hot matmul)
#   h     = relu([pair_src | pair_dst] @ [W1a; W1b] + b1)    (split-weight concat)
#   inter = h @ W2 + b2
# All matmul operands bf16, f32 accumulation, f32 elementwise. Padded lanes of
# the weights are zero, so padded output lanes are exact zeros / bias and are
# sliced off in the wrapper. Padded *rows* (frames beyond BT) hold relu(bias)
# garbage but are never addressed by act_rows / pair_rows (invariant).
# ----------------------------------------------------------------------------
def _fused_fc_kernel(crops_ref, w_emb_ref, b_emb_ref, w_act_ref, b_act_ref,
                     sel_ref, w1_ref, b1_ref, w2_ref, b2_ref,
                     act_ref, inter_ref):
    f32, bf16 = jnp.float32, jnp.bfloat16

    emb = jnp.dot(crops_ref[...], w_emb_ref[...], preferred_element_type=f32)
    emb = jnp.maximum(emb + b_emb_ref[...], 0.0)                 # (Mb, NFBp) f32
    emb_b = emb.astype(bf16)

    act_ref[...] = (jnp.dot(emb_b, w_act_ref[...], preferred_element_type=f32)
                    + b_act_ref[...])                            # (Mb, NAp)

    # Ordered-pair gather: one stacked [src; dst] one-hot matmul on the MXU.
    pair = jnp.dot(sel_ref[...], emb_b, preferred_element_type=f32)   # (2*Pb, NFBp)
    Pb = pair.shape[0] // 2
    pair_cat = jnp.concatenate([pair[:Pb], pair[Pb:]], axis=1)         # (Pb, 2*NFBp)

    h = jnp.dot(pair_cat.astype(bf16), w1_ref[...], preferred_element_type=f32)
    h = jnp.maximum(h + b1_ref[...], 0.0)                              # (Pb, HIp)

    inter_ref[...] = (jnp.dot(h.astype(bf16), w2_ref[...], preferred_element_type=f32)
                      + b2_ref[...])                                   # (Pb, NIp)


def fused_fc_pallas(crops_p, prep):
    NBp, Kcp = crops_p.shape
    two_pb, Mb = prep["sel_p"].shape
    Pb = two_pb // 2
    nblk = NBp // Mb
    NAp = prep["w_act_p"].shape[1]
    NIp = prep["w_int2_p"].shape[1]

    def full(a):
        return pl.BlockSpec(a.shape, lambda b: (0,) * a.ndim)

    ins = [crops_p, prep["w_emb_p"], prep["b_emb_p"], prep["w_act_p"],
           prep["b_act_p"], prep["sel_p"], prep["w_int1_p"], prep["b_int1_p"],
           prep["w_int2_p"], prep["b_int2_p"]]
    in_specs = [pl.BlockSpec((Mb, Kcp), lambda b: (b, 0))] + [full(a) for a in ins[1:]]

    return pl.pallas_call(
        _fused_fc_kernel,
        out_shape=(jax.ShapeDtypeStruct((NBp, NAp), jnp.float32),
                   jax.ShapeDtypeStruct((nblk * Pb, NIp), jnp.float32)),
        grid=(nblk,),
        in_specs=in_specs,
        out_specs=(pl.BlockSpec((Mb, NAp), lambda b: (b, 0)),
                   pl.BlockSpec((Pb, NIp), lambda b: (b, 0))),
        compiler_params=pltpu.CompilerParams(dimension_semantics=("parallel",)),
    )(*ins)


# ----------------------------------------------------------------------------
# Deterministic parameter init (kaiming_normal_ on weights, like the module)
# ----------------------------------------------------------------------------
def kaiming_linear(key, fan_in, fan_out):
    kw, kb = jax.random.split(key)
    w = jax.random.normal(kw, (fan_in, fan_out), jnp.float32) * jnp.sqrt(2.0 / fan_in)
    bound = 1.0 / float(np.sqrt(fan_in))
    b = jax.random.uniform(kb, (fan_out,), jnp.float32, -bound, bound)
    return w, b


def _pad2(a, rows, cols):
    return jnp.pad(a, ((0, rows - a.shape[0]), (0, cols - a.shape[1])))


def _pad_bias(b, cols):
    return jnp.pad(b, (0, cols - b.shape[0])).reshape(1, cols)


def prepare_padded_params(params, cfg, FPB):
    """Pad weights to 128-multiple lane/contraction dims (bf16 for matmul
    operands, f32 biases) and build the per-block stacked pair selector."""
    D = cfg.emb_features
    K = cfg.crop_size[0]
    NFB = cfg.num_features_boxes
    MAX_N = cfg.num_boxes
    NA = cfg.num_actions
    Kc = D * K * K
    Kcp = _round_up(Kc, LANE)
    NFBp = _round_up(NFB, LANE)
    NAp = _round_up(NA, LANE)
    HI = params["fc_int1_w"].shape[1]
    HIp = _round_up(HI, LANE)
    NIp = _round_up(params["fc_int2_w"].shape[1], LANE)
    bf16 = jnp.bfloat16

    # Permute fc_emb_1 rows from torch flatten order (d,k,l) to channel-last
    # (k,l,d) so the crops need no transpose between roi_align and the kernel.
    w_emb = params["fc_emb_1_w"].reshape(D, K, K, NFB)
    w_emb = jnp.transpose(w_emb, (1, 2, 0, 3)).reshape(Kc, NFB)

    # Stack fc_interactions1 so one matmul consumes the lane-concatenated
    # (src | dst) embedding: rows [0:NFB] -> src half, [NFBp:NFBp+NFB] -> dst.
    w1 = params["fc_int1_w"]
    w1_stacked = jnp.zeros((2 * NFBp, HI), jnp.float32)
    w1_stacked = w1_stacked.at[:NFB].set(w1[:NFB]).at[NFBp:NFBp + NFB].set(w1[NFB:])

    prep = {
        "conv_w": params["conv1x1_w"],
        "conv_b": params["conv1x1_b"],
        "w_emb_p": _pad2(w_emb, Kcp, NFBp).astype(bf16),
        "b_emb_p": _pad_bias(params["fc_emb_1_b"], NFBp),
        "w_act_p": _pad2(params["fc_actions_w"], NFBp, NAp).astype(bf16),
        "b_act_p": _pad_bias(params["fc_actions_b"], NAp),
        "w_int1_p": _pad2(w1_stacked, 2 * NFBp, HIp).astype(bf16),
        "b_int1_p": _pad_bias(params["fc_int1_b"], HIp),
        "w_int2_p": _pad2(params["fc_int2_w"], HIp, NIp).astype(bf16),
        "b_int2_p": _pad_bias(params["fc_int2_b"], NIp),
    }

    # Per-block (FPB frames) ordered-pair one-hot selector, stacked [src; dst].
    # Block-diagonal per frame and identical for every grid block, so memory /
    # MXU work is O(FPB^2) = constant instead of O(BT^2).
    Pper = MAX_N * (MAX_N - 1)
    Mb = FPB * MAX_N
    Pb = FPB * Pper
    sel = np.zeros((2 * Pb, Mb), np.float32)
    r = 0
    for f in range(FPB):
        for i in range(MAX_N):
            for j in range(MAX_N):
                if i != j:
                    sel[r, f * MAX_N + i] = 1.0
                    sel[Pb + r, f * MAX_N + j] = 1.0
                    r += 1
    prep["sel_p"] = jnp.asarray(sel, bf16)
    return prep


def build_ragged_indices(bboxes_num_in, B, T, MAX_N):
    """Host-side once per batch (output shapes are data-dependent/ragged);
    everything downstream is jitted and stays on device."""
    nums = np.asarray(bboxes_num_in).reshape(B * T).astype(np.int64)
    Pper = MAX_N * (MAX_N - 1)
    act_rows, pair_rows = [], []
    for bt in range(B * T):
        n = int(nums[bt])
        act_rows.extend(bt * MAX_N + i for i in range(n))
        for i in range(n):
            for j in range(n):
                if i != j:
                    jj = j if j < i else j - 1
                    pair_rows.append(bt * Pper + i * (MAX_N - 1) + jj)
    return (jnp.asarray(np.asarray(act_rows, dtype=np.int32)),
            jnp.asarray(np.asarray(pair_rows, dtype=np.int32)))


# ----------------------------------------------------------------------------
# roi_align: separable bilinear sampling at bin centers, channel-last, no
# per-box gather (BT stays a batch dim of the einsum).
# TODO(synk): exact torchvision roi_align (adaptive sampling_ratio averaging,
#             zero-padded out-of-range samples) is not replicated; this samples
#             once at each of the K*K bin centers with spatial_scale=1.0.
# ----------------------------------------------------------------------------
def roi_align_bilinear(feat, boxes, K):
    BT, OH, OW, D = feat.shape
    x1, y1, x2, y2 = boxes[..., 0], boxes[..., 1], boxes[..., 2], boxes[..., 3]
    c = (jnp.arange(K, dtype=jnp.float32) + 0.5) / K
    xs = x1[..., None] + c * (x2 - x1)[..., None]   # (BT, MAX_N, K)
    ys = y1[..., None] + c * (y2 - y1)[..., None]   # (BT, MAX_N, K)

    def interp(coords, size):
        cc = jnp.clip(coords, 0.0, size - 1.0)
        c0 = jnp.floor(cc).astype(jnp.int32)
        c1 = jnp.minimum(c0 + 1, size - 1)
        f = cc - c0.astype(jnp.float32)
        return (jax.nn.one_hot(c0, size, dtype=jnp.float32) * (1.0 - f)[..., None]
                + jax.nn.one_hot(c1, size, dtype=jnp.float32) * f[..., None])

    Wy = interp(ys, OH)                                      # (BT, MAX_N, K, OH)
    Wx = interp(xs, OW)                                      # (BT, MAX_N, K, OW)
    return jnp.einsum('bnkh,bhwd,bnlw->bnkld', Wy, feat, Wx)  # (BT, MAX_N, K, K, D)


# ----------------------------------------------------------------------------
# Jitted Basenet forward
# ----------------------------------------------------------------------------
def make_forward(cfg, FPB):
    H, W = cfg.image_size
    OH, OW = cfg.out_size
    MAX_N = cfg.num_boxes
    D = cfg.emb_features
    K = cfg.crop_size[0]
    NA = cfg.num_actions

    def forward(prep, images_in, boxes_in, act_rows, pair_rows):
        B, T = images_in.shape[0], images_in.shape[1]
        BT = B * T
        BTp = _round_up(BT, FPB)
        NB = BT * MAX_N
        NBp = BTp * MAX_N
        Kc = D * K * K
        Kcp = _round_up(Kc, LANE)

        # Backbone stand-in (plain XLA, fused with the pooling by the compiler):
        # avg-pool to (OH,OW) + 1x1 conv + ReLU, channel-last throughout.
        # TODO(synk): get_backbone(cfg.backbone) and prep_images() are external.
        imgs = images_in.reshape(BT, 3, H, W)
        x = imgs.reshape(BT, 3, OH, H // OH, OW, W // OW).mean(axis=(3, 5))
        x = jnp.transpose(x, (0, 2, 3, 1))                                # (BT,OH,OW,3)
        feat = jax.nn.relu(jnp.einsum('bhwc,cd->bhwd', x, prep["conv_w"])
                           + prep["conv_b"])                              # (BT,OH,OW,D)

        # roi_align at K*K bin centers (spatial_scale = 1.0), channel-last
        # (k,l,d) flatten — matched by the permuted fc_emb_1 weight rows.
        crops = roi_align_bilinear(feat, boxes_in.reshape(BT, MAX_N, 4), K)
        crops_flat = crops.reshape(NB, Kc)
        crops_p = jnp.pad(crops_flat, ((0, NBp - NB), (0, Kcp - Kc)))
        crops_p = crops_p.astype(jnp.bfloat16)

        # Fused FC chain: one Pallas call, grid over frame blocks, everything
        # per-block resident in VMEM (few MB/block, well under default limits).
        act_dense, inter_dense = fused_fc_pallas(crops_p, prep)

        # Ragged row selection (indices precomputed on host from bboxes_num_in;
        # they never address padded frame rows — see kernel invariant note).
        actions_scores = act_dense[act_rows][:, :NA]
        interaction_scores = inter_dense[pair_rows][:, :2]
        return actions_scores, interaction_scores

    return jax.jit(forward)


if __name__ == "__main__":
    cfg = Cfg()
    B, T = 2, 1
    H, W = cfg.image_size
    OH, OW = cfg.out_size
    MAX_N = cfg.num_boxes
    D = cfg.emb_features
    K = cfg.crop_size[0]
    NFB = cfg.num_features_boxes

    key = jax.random.PRNGKey(0)
    keys = jax.random.split(key, 8)

    params = {}
    params["conv1x1_w"], params["conv1x1_b"] = kaiming_linear(keys[0], 3, D)
    params["fc_emb_1_w"], params["fc_emb_1_b"] = kaiming_linear(keys[1], K * K * D, NFB)
    params["fc_actions_w"], params["fc_actions_b"] = kaiming_linear(keys[2], NFB, cfg.num_actions)
    params["fc_int1_w"], params["fc_int1_b"] = kaiming_linear(keys[3], 2 * NFB, 128)
    params["fc_int2_w"], params["fc_int2_b"] = kaiming_linear(keys[4], 128, 2)

    images_in = jax.random.uniform(keys[5], (B, T, 3, H, W), jnp.float32)
    # Boxes in feature-map coordinates (roi_align default spatial_scale=1.0).
    cxy = jax.random.uniform(keys[6], (B, T, MAX_N, 2), jnp.float32,
                             1.0, min(OH, OW) - 1.0)
    half = jax.random.uniform(keys[7], (B, T, MAX_N, 2), jnp.float32, 0.5, 2.0)
    bounds = jnp.asarray([OW - 1.0, OH - 1.0], jnp.float32)  # clip x with OW, y with OH
    x1y1 = jnp.clip(cxy - half, 0.0, bounds)
    x2y2 = jnp.clip(cxy + half, 0.0, bounds)
    boxes_in = jnp.concatenate([x1y1, x2y2], axis=-1)        # (B, T, MAX_N, 4)
    bboxes_num_in = jnp.asarray([[3], [4]], jnp.int32)       # (B, T), N <= MAX_N

    FPB = _choose_fpb(B * T, MAX_N)
    prep = prepare_padded_params(params, cfg, FPB)
    act_rows, pair_rows = build_ragged_indices(bboxes_num_in, B, T, MAX_N)
    forward = make_forward(cfg, FPB)

    actions_scores, interaction_scores = forward(
        prep, images_in, boxes_in, act_rows, pair_rows)
    jax.block_until_ready((actions_scores, interaction_scores))

    assert actions_scores.shape == (3 + 4, cfg.num_actions)
    assert interaction_scores.shape == (3 * 2 + 4 * 3, 2)
    print("KERNEL_OK")
</pallas_src>

<mosaic_0001>
module attributes {stable_mosaic.version = 11 : i64} {
  func.func @_fused_fc_kernel(%arg0: i32, %arg1: memref<8x256xbf16, #tpu.memory_space<vmem>>, %arg2: memref<256x128xbf16, #tpu.memory_space<vmem>>, %arg3: memref<1x128xf32, #tpu.memory_space<vmem>>, %arg4: memref<128x128xbf16, #tpu.memory_space<vmem>>, %arg5: memref<1x128xf32, #tpu.memory_space<vmem>>, %arg6: memref<48x8xbf16, #tpu.memory_space<vmem>>, %arg7: memref<256x128xbf16, #tpu.memory_space<vmem>>, %arg8: memref<1x128xf32, #tpu.memory_space<vmem>>, %arg9: memref<128x128xbf16, #tpu.memory_space<vmem>>, %arg10: memref<1x128xf32, #tpu.memory_space<vmem>>, %arg11: memref<8x128xf32, #tpu.memory_space<vmem>>, %arg12: memref<24x128xf32, #tpu.memory_space<vmem>>) attributes {dimension_semantics = [#tpu.dimension_semantics<parallel>], iteration_bounds = array<i64: 1>, scalar_prefetch = 0 : i64, scratch_operands = 0 : i64, tpu.core_type = #tpu.core_type<tc>, window_params = [{transform_indices = @transform_0, window_bounds = array<i64: 8, 256>}, {pipeline_mode = #tpu.pipeline_mode<synchronous>, transform_indices = @transform_1, window_bounds = array<i64: 256, 128>}, {pipeline_mode = #tpu.pipeline_mode<synchronous>, transform_indices = @transform_2, window_bounds = array<i64: 1, 128>}, {pipeline_mode = #tpu.pipeline_mode<synchronous>, transform_indices = @transform_3, window_bounds = array<i64: 128, 128>}, {pipeline_mode = #tpu.pipeline_mode<synchronous>, transform_indices = @transform_4, window_bounds = array<i64: 1, 128>}, {pipeline_mode = #tpu.pipeline_mode<synchronous>, transform_indices = @transform_5, window_bounds = array<i64: 48, 8>}, {pipeline_mode = #tpu.pipeline_mode<synchronous>, transform_indices = @transform_6, window_bounds = array<i64: 256, 128>}, {pipeline_mode = #tpu.pipeline_mode<synchronous>, transform_indices = @transform_7, window_bounds = array<i64: 1, 128>}, {pipeline_mode = #tpu.pipeline_mode<synchronous>, transform_indices = @transform_8, window_bounds = array<i64: 128, 128>}, {pipeline_mode = #tpu.pipeline_mode<synchronous>, transform_indices = @transform_9, window_bounds = array<i64: 1, 128>}, {transform_indices = @transform_10, window_bounds = array<i64: 8, 128>}, {transform_indices = @transform_11, window_bounds = array<i64: 24, 128>}]} {
    %c0 = arith.constant 0 : index
    %c0_0 = arith.constant 0 : index
    %0 = vector.load %arg1[%c0, %c0_0] : memref<8x256xbf16, #tpu.memory_space<vmem>>, vector<8x256xbf16>
    %c0_1 = arith.constant 0 : index
    %c0_2 = arith.constant 0 : index
    %1 = vector.load %arg2[%c0_1, %c0_2] : memref<256x128xbf16, #tpu.memory_space<vmem>>, vector<256x128xbf16>
    %cst = arith.constant dense<0.000000e+00> : vector<8x128xf32>
    %2 = tpu.matmul %0, %1, %cst {dimension_numbers = #tpu.dot_dimension_numbers<[1], [0], [0], [1], [0, 0, 1, 1], [], []>} : vector<8x256xbf16>, vector<256x128xbf16>, vector<8x128xf32> -> vector<8x128xf32>
    %c0_3 = arith.constant 0 : index
    %c0_4 = arith.constant 0 : index
    %3 = vector.load %arg3[%c0_3, %c0_4] : memref<1x128xf32, #tpu.memory_space<vmem>>, vector<1x128xf32>
    %4 = vector.broadcast %3 : vector<1x128xf32> to vector<8x128xf32>
    %5 = arith.addf %2, %4 : vector<8x128xf32>
    %cst_5 = arith.constant 0.000000e+00 : f32
    %6 = vector.broadcast %cst_5 : f32 to vector<8x128xf32>
    %7 = arith.maximumf %5, %6 : vector<8x128xf32>
    %8 = arith.truncf %7 : vector<8x128xf32> to vector<8x128xbf16>
    %c0_6 = arith.constant 0 : index
    %c0_7 = arith.constant 0 : index
    %9 = vector.load %arg4[%c0_6, %c0_7] : memref<128x128xbf16, #tpu.memory_space<vmem>>, vector<128x128xbf16>
    %cst_8 = arith.constant dense<0.000000e+00> : vector<8x128xf32>
    %10 = tpu.matmul %8, %9, %cst_8 {dimension_numbers = #tpu.dot_dimension_numbers<[1], [0], [0], [1], [0, 0, 1, 1], [], []>} : vector<8x128xbf16>, vector<128x128xbf16>, vector<8x128xf32> -> vector<8x128xf32>
    %c0_9 = arith.constant 0 : index
    %c0_10 = arith.constant 0 : index
    %11 = vector.load %arg5[%c0_9, %c0_10] : memref<1x128xf32, #tpu.memory_space<vmem>>, vector<1x128xf32>
    %12 = vector.broadcast %11 : vector<1x128xf32> to vector<8x128xf32>
    %13 = arith.addf %10, %12 : vector<8x128xf32>
    %c0_11 = arith.constant 0 : index
    %c0_12 = arith.constant 0 : index
    %14 = vector.load %arg11[%c0_11, %c0_12] : memref<8x128xf32, #tpu.memory_space<vmem>>, vector<8x128xf32>
    tpu.vector_store %arg11[%c0_11, %c0_12], %13 {strides = array<i32>} : memref<8x128xf32, #tpu.memory_space<vmem>>, vector<8x128xf32>,
    %c0_13 = arith.constant 0 : index
    %c0_14 = arith.constant 0 : index
    %15 = vector.load %arg6[%c0_13, %c0_14] : memref<48x8xbf16, #tpu.memory_space<vmem>>, vector<48x8xbf16>
    %cst_15 = arith.constant dense<0.000000e+00> : vector<48x128xf32>
    %16 = tpu.matmul %15, %8, %cst_15 {dimension_numbers = #tpu.dot_dimension_numbers<[1], [0], [0], [1], [0, 0, 1, 1], [], []>} : vector<48x8xbf16>, vector<8x128xbf16>, vector<48x128xf32> -> vector<48x128xf32>
    %17 = vector.extract_strided_slice %16 {offsets = [0, 0], sizes = [24, 128], strides = [1, 1]} : vector<48x128xf32> to vector<24x128xf32>
    %18 = vector.extract_strided_slice %16 {offsets = [24, 0], sizes = [24, 128], strides = [1, 1]} : vector<48x128xf32> to vector<24x128xf32>
    %19 = tpu.concatenate %17, %18 in 1 : vector<24x128xf32>, vector<24x128xf32> -> vector<24x256xf32>
    %20 = arith.truncf %19 : vector<24x256xf32> to vector<24x256xbf16>
    %c0_16 = arith.constant 0 : index
    %c0_17 = arith.constant 0 : index
    %21 = vector.load %arg7[%c0_16, %c0_17] : memref<256x128xbf16, #tpu.memory_space<vmem>>, vector<256x128xbf16>
    %cst_18 = arith.constant dense<0.000000e+00> : vector<24x128xf32>
    %22 = tpu.matmul %20, %21, %cst_18 {dimension_numbers = #tpu.dot_dimension_numbers<[1], [0], [0], [1], [0, 0, 1, 1], [], []>} : vector<24x256xbf16>, vector<256x128xbf16>, vector<24x128xf32> -> vector<24x128xf32>
    %c0_19 = arith.constant 0 : index
    %c0_20 = arith.constant 0 : index
    %23 = vector.load %arg8[%c0_19, %c0_20] : memref<1x128xf32, #tpu.memory_space<vmem>>, vector<1x128xf32>
    %24 = vector.broadcast %23 : vector<1x128xf32> to vector<24x128xf32>
    %25 = arith.addf %22, %24 : vector<24x128xf32>
    %cst_21 = arith.constant 0.000000e+00 : f32
    %26 = vector.broadcast %cst_21 : f32 to vector<24x128xf32>
    %27 = arith.maximumf %25, %26 : vector<24x128xf32>
    %28 = arith.truncf %27 : vector<24x128xf32> to vector<24x128xbf16>
    %c0_22 = arith.constant 0 : index
    %c0_23 = arith.constant 0 : index
    %29 = vector.load %arg9[%c0_22, %c0_23] : memref<128x128xbf16, #tpu.memory_space<vmem>>, vector<128x128xbf16>
    %cst_24 = arith.constant dense<0.000000e+00> : vector<24x128xf32>
    %30 = tpu.matmul %28, %29, %cst_24 {dimension_numbers = #tpu.dot_dimension_numbers<[1], [0], [0], [1], [0, 0, 1, 1], [], []>} : vector<24x128xbf16>, vector<128x128xbf16>, vector<24x128xf32> -> vector<24x128xf32>
    %c0_25 = arith.constant 0 : index
    %c0_26 = arith.constant 0 : index
    %31 = vector.load %arg10[%c0_25, %c0_26] : memref<1x128xf32, #tpu.memory_space<vmem>>, vector<1x128xf32>
    %32 = vector.broadcast %31 : vector<1x128xf32> to vector<24x128xf32>
    %33 = arith.addf %30, %32 : vector<24x128xf32>
    %c0_27 = arith.constant 0 : index
    %c0_28 = arith.constant 0 : index
    %34 = vector.load %arg12[%c0_27, %c0_28] : memref<24x128xf32, #tpu.memory_space<vmem>>, vector<24x128xf32>
    tpu.vector_store %arg12[%c0_27, %c0_28], %33 {strides = array<i32>} : memref<24x128xf32, #tpu.memory_space<vmem>>, vector<24x128xf32>,
    return
  }
  func.func @transform_0(%arg0: i32) -> (i32, i32) {
    %c0_i32 = arith.constant 0 : i32
    %c0_i32_0 = arith.constant 0 : i32
    return %arg0, %c0_i32 : i32, i32
  }
  func.func @transform_1(%arg0: i32) -> (i32, i32) {
    %c0_i32 = arith.constant 0 : i32
    %c0_i32_0 = arith.constant 0 : i32
    %c0_i32_1 = arith.constant 0 : i32
    return %c0_i32, %c0_i32_0 : i32, i32
  }
  func.func @transform_2(%arg0: i32) -> (i32, i32) {
    %c0_i32 = arith.constant 0 : i32
    %c0_i32_0 = arith.constant 0 : i32
    %c0_i32_1 = arith.constant 0 : i32
    return %c0_i32, %c0_i32_0 : i32, i32
  }
  func.func @transform_3(%arg0: i32) -> (i32, i32) {
    %c0_i32 = arith.constant 0 : i32
    %c0_i32_0 = arith.constant 0 : i32
    %c0_i32_1 = arith.constant 0 : i32
    return %c0_i32, %c0_i32_0 : i32, i32
  }
  func.func @transform_4(%arg0: i32) -> (i32, i32) {
    %c0_i32 = arith.constant 0 : i32
    %c0_i32_0 = arith.constant 0 : i32
    %c0_i32_1 = arith.constant 0 : i32
    return %c0_i32, %c0_i32_0 : i32, i32
  }
  func.func @transform_5(%arg0: i32) -> (i32, i32) {
    %c0_i32 = arith.constant 0 : i32
    %c0_i32_0 = arith.constant 0 : i32
    %c0_i32_1 = arith.constant 0 : i32
    return %c0_i32, %c0_i32_0 : i32, i32
  }
  func.func @transform_6(%arg0: i32) -> (i32, i32) {
    %c0_i32 = arith.constant 0 : i32
    %c0_i32_0 = arith.constant 0 : i32
    %c0_i32_1 = arith.constant 0 : i32
    return %c0_i32, %c0_i32_0 : i32, i32
  }
  func.func @transform_7(%arg0: i32) -> (i32, i32) {
    %c0_i32 = arith.constant 0 : i32
    %c0_i32_0 = arith.constant 0 : i32
    %c0_i32_1 = arith.constant 0 : i32
    return %c0_i32, %c0_i32_0 : i32, i32
  }
  func.func @transform_8(%arg0: i32) -> (i32, i32) {
    %c0_i32 = arith.constant 0 : i32
    %c0_i32_0 = arith.constant 0 : i32
    %c0_i32_1 = arith.constant 0 : i32
    return %c0_i32, %c0_i32_0 : i32, i32
  }
  func.func @transform_9(%arg0: i32) -> (i32, i32) {
    %c0_i32 = arith.constant 0 : i32
    %c0_i32_0 = arith.constant 0 : i32
    %c0_i32_1 = arith.constant 0 : i32
    return %c0_i32, %c0_i32_0 : i32, i32
  }
  func.func @transform_10(%arg0: i32) -> (i32, i32) {
    %c0_i32 = arith.constant 0 : i32
    %c0_i32_0 = arith.constant 0 : i32
    return %arg0, %c0_i32 : i32, i32
  }
  func.func @transform_11(%arg0: i32) -> (i32, i32) {
    %c0_i32 = arith.constant 0 : i32
    %c0_i32_0 = arith.constant 0 : i32
    return %arg0, %c0_i32 : i32, i32
  }
}

</mosaic_0001>

<bundles_post_ra>
// kernel: forward.1
= control target key start
LH: loop header
LB: loop body
LE: loop exit
PB: predicated region body
PF: predicated region fallthrough
CT: control target
= control target key end

     0   :  { %v991_v1 = vmov 0.0   ;;  %vm992_vm0 = vmmov 0   ;;  %vm366_vm1 = vcmask 1043456   ;;  %vm356_vm2 = vcmask 64512   ;;  %s1250_s1 = inlined_call_operand.vmem [shape: bf16[256,128], index: 1, kind: input, shape index: {}]   ;;  %s1251_s0 = inlined_call_operand.vmem [shape: bf16[8,256], index: 0, kind: input, shape index: {}]   ;;  %s1252_s3 = inlined_call_operand.vmem [shape: bf16[128,128], index: 3, kind: input, shape index: {}]   ;;  %s1253_s5 = inlined_call_operand.vmem [shape: bf16[48,8], index: 5, kind: input, shape index: {}]   ;;  %s1254_s6 = inlined_call_operand.vmem [shape: bf16[256,128], index: 6, kind: input, shape index: {}]   ;;  %s1255_s2 = inlined_call_operand.vmem [shape: f32[1,128], index: 2, kind: input, shape index: {}]   ;;  %s1256_s8 = inlined_call_operand.vmem [shape: bf16[128,128], index: 8, kind: input, shape index: {}]   ;;  %s1257_s4 = inlined_call_operand.vmem [shape: f32[1,128], index: 4, kind: input, shape index: {}]   ;;  %s1258_s10 = inlined_call_operand.vmem [shape: f32[8,128], index: 10, kind: output, shape index: {0}]   ;;  %s1259_s7 = inlined_call_operand.vmem [shape: f32[1,128], index: 7, kind: input, shape index: {}]   ;;  %s1260_s9 = inlined_call_operand.vmem [shape: f32[1,128], index: 9, kind: input, shape index: {}]   ;;  %s1261_s11 = inlined_call_operand.vmem [shape: f32[24,128], index: 11, kind: output, shape index: {1}]  }
   0x1   :  { %v938_v0 = vld [vmem:[%s1250_s1 + $0x78] sm:$0xff]   ;;  %882 = vmatprep.subr.bf16.mxu1 %v991_v1  ;;  %v940_v3 = vld [vmem:[%s1250_s1 + $0x70] sm:$0xff]   ;;  %v942_v5 = vld [vmem:[%s1250_s1 + $0x68] sm:$0xff]   ;;  %898 = vmatprep.mubr.msk.bf16.mxu1 %vm992_vm0, %v991_v1 }
   0x2   :  { %v939_v2 = vld [vmem:[%s1250_s1 + $0x38] sm:$0xff]   ;;  %809 = vmatprep.subr.bf16.mxu0 %v938_v0  ;;  %v941_v4 = vld [vmem:[%s1250_s1 + $0x30] sm:$0xff]   ;;  %v943_v6 = vld [vmem:[%s1250_s1 + $0x28] sm:$0xff]  }
   0x3   :  { %810 = vmatpush3.bf16.msra.mxu0 %v939_v2  ;;  %v944_v7 = vld [vmem:[%s1250_s1 + $0x60] sm:$0xff]   ;;  %v946_v9 = vld [vmem:[%s1250_s1 + $0x58] sm:$0xff]   ;;  %v948_v11 = vld [vmem:[%s1250_s1 + $0x50] sm:$0xff]  }
   0x4   :  { %811 = vmatprep.subr.bf16.mxu0 %v940_v3  ;;  %v945_v8 = vld [vmem:[%s1250_s1 + $0x20] sm:$0xff]   ;;  %v947_v10 = vld [vmem:[%s1250_s1 + $0x18] sm:$0xff]   ;;  %v949_v15 = vld [vmem:[%s1250_s1 + $0x10] sm:$0xff]  }
   0x5   :  { %v38_v12 = vld [vmem:[%s1251_s0] sm:$0xff]  ;;  %v956_v14 = vld [vmem:[%s1252_s3 + $0x38] sm:$0xff]   ;;  %v950_v16 = vld [vmem:[%s1250_s1 + $0x48] sm:$0xff]  }
   0x6   :  { %v751_v13 = vcombine.high %v38_v12, %v38_v12  ;;  %883 = vmatpush3.bf16.msra.mxu1 %v956_v14  ;;  %v957_v17 = vld [vmem:[%s1252_s3 + $0x30] sm:$0xff]   ;;  %v951_v18 = vld [vmem:[%s1250_s1 + $0x8] sm:$0xff]   ;;  %v952_v19 = vld [vmem:[%s1250_s1 + $0x40] sm:$0xff]   ;;  %v750_v23 = vcombine.low %v38_v12, %v38_v12 }
   0x7   :  { %812 = vmatpush3.bf16.msra.mxu0 %v941_v4  ;;  %884 = vmatprep.subr.bf16.mxu1 %v991_v1  ;;  %v958_v20 = vld [vmem:[%s1252_s3 + $0x28] sm:$0xff]   ;;  %v953_v21 = vld [vmem:[%s1250_s1] sm:$0xff]   ;;  %v960_v24 = vld [vmem:[%s1252_s3 + $0x18] sm:$0xff]  }
   0x8   :  { %813 = vmatprep.subr.bf16.mxu0 %v942_v5  ;;  %213 = vmatprep.mubr.bf16.mxu0 %v751_v13  ;;  %v959_v22 = vld [vmem:[%s1252_s3 + $0x20] sm:$0xff]   ;;  %v961_v25 = vld [vmem:[%s1252_s3 + $0x10] sm:$0xff]   ;;  %v962_v26 = vld [vmem:[%s1252_s3 + $0x8] sm:$0xff]  }
   0x9   :  { %v963_v27 = vld [vmem:[%s1252_s3] sm:$0xff]   ;;  %v967_v28 = vld [vmem:[%s1254_s6 + $0x78] sm:$0xff]   ;;  %v969_v39 = vld [vmem:[%s1254_s6 + $0x70] sm:$0xff]  }
   0xa   :  { %885 = vmatpush3.bf16.msra.mxu1 %v957_v17  ;;  %v749_v30 = vld [vmem:[%s1255_s2] ss:$0 sm:$0xff]  ;;  %v968_v37 = vld [vmem:[%s1254_s6 + $0x38] sm:$0xff]   ;;  %v970_v42 = vld [vmem:[%s1254_s6 + $0x30] sm:$0xff]  }
   0xb   :  { %814 = vmatpush3.bf16.msra.mxu0 %v943_v6  ;;  %886 = vmatprep.subr.bf16.mxu1 %v991_v1  ;;  %v964_v41 = vld [vmem:[%s1253_s5] sm:$0xff]   ;;  %v965_v43 = vld [vmem:[%s1253_s5 + $0x8] sm:$0xff]   ;;  %v966_v44 = vld [vmem:[%s1253_s5 + $0x10] sm:$0xff]  }
   0xc   :  { %815 = vmatprep.subr.bf16.mxu0 %v944_v7  ;;  %v971_v45 = vld [vmem:[%s1254_s6 + $0x68] sm:$0xff]   ;;  %v973_v47 = vld [vmem:[%s1254_s6 + $0x60] sm:$0xff]   ;;  %v975_v49 = vld [vmem:[%s1254_s6 + $0x58] sm:$0xff]  }
   0xd   :  { %v972_v46 = vld [vmem:[%s1254_s6 + $0x28] sm:$0xff]   ;;  %v974_v48 = vld [vmem:[%s1254_s6 + $0x20] sm:$0xff]   ;;  %v976_v50 = vld [vmem:[%s1254_s6 + $0x18] sm:$0xff]  }
   0xe   :  { %887 = vmatpush3.bf16.msra.mxu1 %v958_v20  ;;  %v977_v51 = vld [vmem:[%s1254_s6 + $0x50] sm:$0xff]   ;;  %v979_v53 = vld [vmem:[%s1254_s6 + $0x48] sm:$0xff]   ;;  %v981_v55 = vld [vmem:[%s1254_s6 + $0x40] sm:$0xff]  }
   0xf   :  { %816 = vmatpush3.bf16.msra.mxu0 %v945_v8  ;;  %888 = vmatprep.subr.bf16.mxu1 %v991_v1  ;;  %v978_v52 = vld [vmem:[%s1254_s6 + $0x10] sm:$0xff]   ;;  %v980_v54 = vld [vmem:[%s1254_s6 + $0x8] sm:$0xff]   ;;  %v982_v56 = vld [vmem:[%s1254_s6] sm:$0xff]  }
  0x10   :  { %817 = vmatprep.subr.bf16.mxu0 %v946_v9  ;;  %v983_v57 = vld [vmem:[%s1256_s8 + $0x38] sm:$0xff]   ;;  %v984_v58 = vld [vmem:[%s1256_s8 + $0x30] sm:$0xff]   ;;  %v985_v59 = vld [vmem:[%s1256_s8 + $0x28] sm:$0xff]  }
  0x11   :  { %v986_v60 = vld [vmem:[%s1256_s8 + $0x20] sm:$0xff]   ;;  %v988_v20 = vld [vmem:[%s1256_s8 + $0x10] sm:$0xff]  }
  0x12   :  { %889 = vmatpush3.bf16.msra.mxu1 %v959_v22  ;;  %v768_v61 = vld [vmem:[%s1257_s4] ss:$0 sm:$0xff] }
  0x13   :  { %818 = vmatpush3.bf16.msra.mxu0 %v947_v10  ;;  %890 = vmatprep.subr.bf16.mxu1 %v991_v1  ;;  %v990_v22 = vld [vmem:[%s1256_s8] sm:$0xff]  }
  0x14   :  { %819 = vmatprep.subr.bf16.mxu0 %v948_v11 }
  0x16   :  { %891 = vmatpush3.bf16.msra.mxu1 %v960_v24 }
  0x17   :  { %820 = vmatpush3.bf16.msra.mxu0 %v949_v15  ;;  %892 = vmatprep.subr.bf16.mxu1 %v991_v1 }
  0x18   :  { %821 = vmatprep.subr.bf16.mxu0 %v950_v16 }
  0x1a   :  { %893 = vmatpush3.bf16.msra.mxu1 %v961_v25 }
  0x1b   :  { %822 = vmatpush3.bf16.msra.mxu0 %v951_v18  ;;  %894 = vmatprep.subr.bf16.mxu1 %v991_v1 }
  0x1c   :  { %823 = vmatprep.subr.bf16.mxu0 %v952_v19  ;;  %v987_v19 = vld [vmem:[%s1256_s8 + $0x18] sm:$0xff]  }
  0x1e   :  { %895 = vmatpush3.bf16.msra.mxu1 %v962_v26  ;;  %v783_v26 = vld [vmem:[%s1259_s7] ss:$0 sm:$0xff] }
  0x1f   :  { %824 = vmatpush3.bf16.msra.mxu0 %v953_v21  ;;  %896 = vmatprep.subr.bf16.mxu1 %v991_v1  ;;  %v989_v21 = vld [vmem:[%s1256_s8 + $0x8] sm:$0xff]  }
  0x20   :  { %902 = vmatprep.subr.bf16.mxu0 %v991_v1 }
  0x22   :  { %214 = vmatmul.mubr.bf16.vlgmr.msra.gmra.mxu0 %v750_v23  ;;  %897 = vmatpush3.bf16.msra.mxu1 %v963_v27 }
  0x23   :  { %904 = vmatprep.mubr.msk.bf16.mxu0 %vm992_vm0, %v991_v1  ;;  %844 = vmatprep.subr.bf16.mxu1 %v967_v28 }
  0xe2   :  { %v825_v29 = vpop.f32.mrf.mxu0 }
  0xe4   :  { %v826_v31 = vpop.f32.mrf.mxu0 }
  0xe5   :  { %v827_v32 = vadd.f32 %v826_v31, %v825_v29 }
  0xe6   :  { %v828_v33 = vpop.f32.mrf.mxu0 }
  0xe7   :  { %v216_v34 = vadd.f32 %v827_v32, %v749_v30 }
  0xe8   :  { %v829_v35 = vpop.f32.mrf.mxu0 }
  0xe9   :  { %v221_v36 = vmax.f32 %v216_v34, 0.0 }
  0xeb   :  { %v222_v38 = vpack.c.bf16 %v221_v36, %v221_v36 }
  0xed   :  { %899 = vmatmul.mubr.bf16.vlgmr.msra.gmra.mxu1 %v222_v38  ;;  %v368_v40 = vsel %vm366_vm1, %v222_v38, 0 }
  0xee   :  { %903 = vmatpush3.bf16.msra.mxu0 %v368_v40  ;;  %845 = vmatpush3.bf16.msra.mxu1 %v968_v37 }
  0xef   :  { %846 = vmatprep.subr.bf16.mxu1 %v969_v39  ;;  %916 = vmatprep.subr.bf16.mxu0 %v983_v57 }
  0xf1   :  { %905 = vmatmul.mubr.msk.bf16.vlgmr.msra.gmra.mxu0 %vm356_vm2, %v964_v41 }
  0xf2   :  { %908 = vmatprep.mubr.msk.bf16.mxu0 %vm992_vm0, %v991_v1  ;;  %847 = vmatpush3.bf16.msra.mxu1 %v970_v42 }
  0xf3   :  { %848 = vmatprep.subr.bf16.mxu1 %v971_v45  ;;  %917 = vmatpush3.bf16.msra.mxu0 %v983_v57 }
  0xf4   :  { %918 = vmatprep.subr.bf16.mxu0 %v984_v58 }
  0xf6   :  { %849 = vmatpush3.bf16.msra.mxu1 %v972_v46 }
  0xf7   :  { %850 = vmatprep.subr.bf16.mxu1 %v973_v47  ;;  %919 = vmatpush3.bf16.msra.mxu0 %v984_v58 }
  0xf8   :  { %920 = vmatprep.subr.bf16.mxu0 %v985_v59 }
  0xf9   :  { %909 = vmatmul.mubr.msk.bf16.gmra.mxu0 %vm356_vm2, %v965_v43  ;;  %v800_v43 = vld [vmem:[%s1260_s9] ss:$0 sm:$0xff] }
  0xfa   :  { %912 = vmatprep.mubr.msk.bf16.mxu0 %vm992_vm0, %v991_v1  ;;  %851 = vmatpush3.bf16.msra.mxu1 %v974_v48 }
  0xfb   :  { %852 = vmatprep.subr.bf16.mxu1 %v975_v49  ;;  %921 = vmatpush3.bf16.msra.mxu0 %v985_v59 }
  0xfc   :  { %922 = vmatprep.subr.bf16.mxu0 %v986_v60 }
  0xfe   :  { %853 = vmatpush3.bf16.msra.mxu1 %v976_v50 }
  0xff   :  { %854 = vmatprep.subr.bf16.mxu1 %v977_v51  ;;  %923 = vmatpush3.bf16.msra.mxu0 %v986_v60 }
 0x100   :  { %924 = vmatprep.subr.bf16.mxu0 %v987_v19 }
 0x101   :  { %913 = vmatmul.mubr.msk.bf16.gmra.mxu0 %vm356_vm2, %v966_v44 }
 0x102   :  { %855 = vmatpush3.bf16.msra.mxu1 %v978_v52 }
 0x103   :  { %856 = vmatprep.subr.bf16.mxu1 %v979_v53  ;;  %925 = vmatpush3.bf16.msra.mxu0 %v987_v19 }
 0x104   :  { %926 = vmatprep.subr.bf16.mxu0 %v988_v20 }
 0x106   :  { %857 = vmatpush3.bf16.msra.mxu1 %v980_v54 }
 0x107   :  { %858 = vmatprep.subr.bf16.mxu1 %v981_v55  ;;  %927 = vmatpush3.bf16.msra.mxu0 %v988_v20 }
 0x108   :  { %928 = vmatprep.subr.bf16.mxu0 %v989_v21 }
 0x10a   :  { %859 = vmatpush3.bf16.msra.mxu1 %v982_v56 }
 0x10b   :  { %929 = vmatpush3.bf16.msra.mxu0 %v989_v21 }
 0x10c   :  { %930 = vmatprep.subr.bf16.mxu0 %v990_v22 }
 0x10f   :  { %931 = vmatpush3.bf16.msra.mxu0 %v990_v22 }
 0x1ad   :  { %v328_v62 = vpop.f32.mrf.mxu1 }
 0x1ae   :  { %v329_v63 = vadd.f32 %v768_v61, %v328_v62 }
 0x1af   :  { %v900_v0 = vpop.f32.mrf.mxu1 }
 0x1b0   :  { %334 = vst [vmem:[%s1258_s10] sm:$0xff] %v329_v63 }
 0x1b1   :  { %v331_v1 = vpop.f32.mrf.mxu1  ;;  %v404_v2 = vpop.f32.mrf.mxu0 }
 0x1b3   :  { %v901_v3 = vpop.f32.mrf.mxu1  ;;  %v906_v4 = vpop.f32.mrf.mxu0 }
 0x1b5   :  { %v407_v5 = vpop.f32.mrf.mxu0 }
 0x1b6   :  { %v427_v13 = vpack.c.bf16 %v407_v5, %v404_v2 }
 0x1b7   :  { %v907_v6 = vpop.f32.mrf.mxu0 }
 0x1b9   :  { %v412_v7 = vpop.f32.mrf.mxu0 }
 0x1ba   :  { %v429_v18 = vpack.c.bf16 %v412_v7, %v412_v7 }
 0x1bb   :  { %v910_v8 = vpop.f32.mrf.mxu0 }
 0x1bd   :  { %v415_v9 = vpop.f32.mrf.mxu0 }
 0x1bf   :  { %v911_v10 = vpop.f32.mrf.mxu0 }
 0x1c1   :  { %v420_v11 = vpop.f32.mrf.mxu0 }
 0x1c2   :  { %v428_v12 = vpack.c.bf16 %v420_v11, %v415_v9 }
 0x1c3   :  { %v914_v14 = vpop.f32.mrf.mxu0 }
 0x1c4   :  { %598 = vmatprep.mubr.bf16.mxu1 %v428_v12 }
 0x1c5   :  { %v423_v15 = vpop.f32.mrf.mxu0  ;;  %599 = vmatmul.mubr.bf16.vlgmr.msra.gmra.mxu1 %v427_v13 }
 0x1c6   :  { %v430_v16 = vpack.c.bf16 %v423_v15, %v423_v15 }
 0x1c7   :  { %v915_v17 = vpop.f32.mrf.mxu0 }
 0x1c8   :  { %606 = vmatprep.mubr.bf16.mxu1 %v430_v16 }
 0x1cd   :  { %607 = vmatmul.mubr.bf16.gmra.mxu1 %v429_v18 }
 0x285   :  { %v860_v23 = vpop.f32.mrf.mxu1 }
 0x287   :  { %v861_v24 = vpop.f32.mrf.mxu1 }
 0x288   :  { %v862_v25 = vadd.f32 %v861_v24, %v860_v23 }
 0x289   :  { %v863_v27 = vpop.f32.mrf.mxu1 }
 0x28a   :  { %v601_v29 = vadd.f32 %v862_v25, %v783_v26 }
 0x28b   :  { %v864_v28 = vpop.f32.mrf.mxu1 }
 0x28c   :  { %v865_v30 = vadd.f32 %v864_v28, %v863_v27  ;;  %v614_v34 = vmax.f32 %v601_v29, 0.0 }
 0x28d   :  { %v866_v31 = vpop.f32.mrf.mxu1 }
 0x28e   :  { %v604_v32 = vadd.f32 %v865_v30, %v783_v26 }
 0x28f   :  { %v867_v33 = vpop.f32.mrf.mxu1 }
 0x290   :  { %v615_v35 = vmax.f32 %v604_v32, 0.0  ;;  %v868_v36 = vadd.f32 %v867_v33, %v866_v31 }
 0x291   :  { %v869_v37 = vpop.f32.mrf.mxu1 }
 0x292   :  { %v609_v38 = vadd.f32 %v868_v36, %v783_v26  ;;  %v617_v39 = vpack.c.bf16 %v615_v35, %v614_v34 }
 0x293   :  { %v870_v40 = vpop.f32.mrf.mxu1 }
 0x294   :  { %v616_v41 = vmax.f32 %v609_v38, 0.0  ;;  %932 = vmatprep.mubr.bf16.mxu0 %v617_v39 }
 0x296   :  { %v618_v42 = vpack.c.bf16 %v616_v41, %v616_v41 }
 0x298   :  { %933 = vmatmul.mubr.bf16.vlgmr.msra.gmra.mxu0 %v618_v42 }
 0x358   :  { %v934_v44 = vpop.f32.mrf.mxu0 }
 0x359   :  { %v733_v45 = vadd.f32 %v934_v44, %v800_v43 }
 0x35a   :  { %v724_v46 = vpop.f32.mrf.mxu0 }
 0x35b   :  { %740 = vst [vmem:[%s1261_s11 + $0x10] sm:$0xff] %v733_v45  ;;  %v725_v47 = vadd.f32 %v800_v43, %v724_v46 }
 0x35c   :  { %v935_v48 = vpop.f32.mrf.mxu0 }
 0x35d   :  { %738 = vst [vmem:[%s1261_s11] sm:$0xff] %v725_v47 }
 0x35e   :  { %v727_v49 = vpop.f32.mrf.mxu0 }
 0x35f   :  { %v728_v50 = vadd.f32 %v800_v43, %v727_v49 }
 0x361   :  { %739 = vst [vmem:[%s1261_s11 + $0x8] sm:$0xff] %v728_v50 }

</bundles_post_ra>
